<compile_context>
chip_gen: v5e
topology: v5e:2x2
jax: 0.10.0
libtpu: 0.0.40
codegen_flags: <defaults>
</compile_context>

<pallas_src>
import jax
import jax.numpy as jnp
from jax import lax
from jax.experimental import pallas as pl
from jax.experimental.pallas import tpu as pltpu

BETA = 0.3
THRESHOLD = 0.2


def feedforward_kernel(x_ref, mix_ref, wgp_ref, ws_ref, out_ref, mem_ref, last_ref):
    """One (TB, TS, D) tile of the spiking feedforward layer.

    x_ref    : (TB, TS, D)  input activation tile
    mix_ref  : (1, D)       token-shift mix vector
    wgp_ref  : (D, 3D)      fused [G | P] weights, stored (in, out)
    ws_ref   : (2D, D)      S weights, stored (in, out)
    out_ref  : (TB, TS, D)  spike outputs
    mem_ref  : (TB, D) f32  LIF membrane, persists across the S grid axis
    last_ref : (TB, D) f32  last input row of the previous S tile (token shift)
    """
    s = pl.program_id(1)
    TB, TS, D = x_ref.shape

    # ---- reset recurrent state at the start of every sequence ----
    @pl.when(s == 0)
    def _():
        mem_ref[...] = jnp.zeros_like(mem_ref)
        last_ref[...] = jnp.zeros_like(last_ref)

    x = x_ref[...]                         # (TB, TS, D)
    boundary = last_ref[...][:, None, :]   # (TB, 1, D): x[:, tile_start-1, :]

    # ---- token shift: mix * x[t] + (1 - mix) * x[t-1]  (x[-1] == 0) ----
    x_prev = jnp.concatenate([boundary, x[:, : TS - 1, :]], axis=1)
    mix = mix_ref[...][None, :, :]         # (1, 1, D), hoisted broadcast
    xs = x * mix + x_prev * (1.0 - mix)

    # carry this tile's last input row into the next S tile
    last_ref[...] = x[:, TS - 1, :]

    # ---- fused G/P projection + squared-ReLU + S projection (MXU) ----
    xs2 = xs.reshape(TB * TS, D)
    h = jnp.dot(xs2, wgp_ref[...], preferred_element_type=jnp.float32)   # (rows, 3D)
    growth = jnp.maximum(h[:, : 2 * D], 0.0)
    growth = growth * growth                                             # relu(.)**2
    gate = jax.nn.sigmoid(h[:, 2 * D :])                                 # (rows, D)
    proj = jnp.dot(growth, ws_ref[...], preferred_element_type=jnp.float32)
    gated = (gate * proj).reshape(TB, TS, D)

    # ---- leaky integrate-and-fire scan, membrane carried across tiles ----
    mem = mem_ref[...]
    for t in range(TS):                    # static unroll of the short scan
        reset = (mem > THRESHOLD).astype(jnp.float32)
        mem = BETA * mem + gated[:, t, :] - reset * THRESHOLD
        spk = (mem > THRESHOLD).astype(jnp.float32)
        out_ref[:, t, :] = spk.astype(out_ref.dtype)
    mem_ref[...] = mem


def feedforward(x, mix, wg, wp, ws, *, tb=None, ts=None):
    """x: (B, S, D); mix: (D,); wg: (D, 2D); wp: (D, D); ws: (2D, D).

    Weights are stored pre-transposed as (in, out); the kernel computes x @ W
    (PyTorch nn.Linear computes x @ W^T).
    """
    B, S, D = x.shape

    if tb is None:
        tb = min(B, 8)
        while B % tb:
            tb -= 1
    if ts is None:
        if S <= 128:
            ts = S
        else:
            ts = 128
            while ts > 0 and S % ts:
                ts -= 8
            if ts <= 0:
                ts = S
    assert B % tb == 0 and S % ts == 0
    assert ts == S or ts % 8 == 0, "sequence tile must be sublane aligned"

    wgp = jnp.concatenate([wg, wp], axis=1)        # (D, 3D): fused [G | P]
    mix2 = mix.reshape(1, D)

    grid = (B // tb, S // ts)
    flops = 2 * B * S * D * (3 * D) + 2 * B * S * (2 * D) * D
    bytes_accessed = 4 * (2 * B * S * D + 3 * D * D + 2 * D * D + D)

    return pl.pallas_call(
        feedforward_kernel,
        out_shape=jax.ShapeDtypeStruct((B, S, D), x.dtype),
        grid_spec=pltpu.PrefetchScalarGridSpec(
            num_scalar_prefetch=0,
            grid=grid,
            in_specs=[
                pl.BlockSpec((tb, ts, D), lambda b, s: (b, s, 0)),
                pl.BlockSpec((1, D), lambda b, s: (0, 0)),
                pl.BlockSpec((D, 3 * D), lambda b, s: (0, 0)),
                pl.BlockSpec((2 * D, D), lambda b, s: (0, 0)),
            ],
            out_specs=pl.BlockSpec((tb, ts, D), lambda b, s: (b, s, 0)),
            scratch_shapes=[
                pltpu.VMEM((tb, D), jnp.float32),   # LIF membrane
                pltpu.VMEM((tb, D), jnp.float32),   # token-shift boundary row
            ],
        ),
        compiler_params=pltpu.CompilerParams(
            dimension_semantics=("parallel", "arbitrary"),
            vmem_limit_bytes=32 * 1024 * 1024,
        ),
        cost_estimate=pl.CostEstimate(
            flops=flops,
            transcendentals=B * S * D,              # sigmoid
            bytes_accessed=bytes_accessed,
        ),
    )(x, mix2, wgp, ws)


def feedforward_reference(x, mix, wg, wp, ws):
    """Pure-JAX reference mirroring the PyTorch module (f32, highest precision)."""
    B, S, D = x.shape
    hp = lax.Precision.HIGHEST
    x_prev = jnp.concatenate([jnp.zeros((B, 1, D), x.dtype), x[:, :-1, :]], axis=1)
    xs = x * mix + x_prev * (1.0 - mix)
    growth = jnp.maximum(jnp.dot(xs, wg, precision=hp), 0.0) ** 2
    gate = jax.nn.sigmoid(jnp.dot(xs, wp, precision=hp))
    gated = gate * jnp.dot(growth, ws, precision=hp)

    def step(mem, inp):
        reset = (mem > THRESHOLD).astype(jnp.float32)
        mem = BETA * mem + inp - reset * THRESHOLD
        spk = (mem > THRESHOLD).astype(jnp.float32)
        return mem, spk

    mem0 = jnp.zeros((B, D), jnp.float32)
    _, spks = lax.scan(step, mem0, jnp.swapaxes(gated, 0, 1))
    return jnp.swapaxes(spks, 0, 1).astype(x.dtype)


if __name__ == "__main__":
    # grid = (2, 2): exercises batch tiling and the cross-tile membrane /
    # token-shift carries while staying small.
    B, S, D = 4, 16, 32

    key = jax.random.PRNGKey(0)
    k_x, k_mix, k_g, k_p, k_s = jax.random.split(key, 5)

    x = jax.random.normal(k_x, (B, S, D), dtype=jnp.float32)

    # Deterministic parameter init (PyTorch-Linear-style uniform bounds),
    # stored as (in_dim, out_dim) so the kernel does x @ W.
    mix = jax.random.uniform(k_mix, (D,), dtype=jnp.float32)
    bnd_g = 1.0 / (D ** 0.5)
    bnd_s = 1.0 / ((2 * D) ** 0.5)
    wg = jax.random.uniform(k_g, (D, 2 * D), minval=-bnd_g, maxval=bnd_g,
                            dtype=jnp.float32)
    wp = jax.random.uniform(k_p, (D, D), minval=-bnd_g, maxval=bnd_g,
                            dtype=jnp.float32)
    ws = jax.random.uniform(k_s, (2 * D, D), minval=-bnd_s, maxval=bnd_s,
                            dtype=jnp.float32)

    out = feedforward(x, mix, wg, wp, ws, tb=2, ts=8)
    jax.block_until_ready(out)
    assert out.shape == (B, S, D)

    # Spikes are 0/1; allow a tiny mismatch budget for membranes that land
    # within MXU-vs-XLA float error of the 0.2 threshold.
    ref = feedforward_reference(x, mix, wg, wp, ws)
    mismatch = float(jnp.mean((out != ref).astype(jnp.float32)))
    assert mismatch <= 0.02, f"spike mismatch fraction too high: {mismatch}"

    print("KERNEL_OK")
</pallas_src>

<mosaic_0001>
module attributes {stable_mosaic.version = 11 : i64} {
  func.func @feedforward_kernel(%arg0: i32, %arg1: i32, %arg2: memref<2x8x32xf32, #tpu.memory_space<vmem>>, %arg3: memref<1x32xf32, #tpu.memory_space<vmem>>, %arg4: memref<32x96xf32, #tpu.memory_space<vmem>>, %arg5: memref<64x32xf32, #tpu.memory_space<vmem>>, %arg6: memref<2x8x32xf32, #tpu.memory_space<vmem>>, %arg7: memref<2x32xf32, #tpu.memory_space<vmem>>, %arg8: memref<2x32xf32, #tpu.memory_space<vmem>>) attributes {dimension_semantics = [#tpu.dimension_semantics<parallel>, #tpu.dimension_semantics<arbitrary>], iteration_bounds = array<i64: 2, 2>, scalar_prefetch = 0 : i64, scratch_operands = 2 : i64, tpu.core_type = #tpu.core_type<tc>, window_params = [{transform_indices = @transform_0, window_bounds = array<i64: 2, 8, 32>}, {pipeline_mode = #tpu.pipeline_mode<synchronous>, transform_indices = @transform_1, window_bounds = array<i64: 1, 32>}, {pipeline_mode = #tpu.pipeline_mode<synchronous>, transform_indices = @transform_2, window_bounds = array<i64: 32, 96>}, {pipeline_mode = #tpu.pipeline_mode<synchronous>, transform_indices = @transform_3, window_bounds = array<i64: 64, 32>}, {transform_indices = @transform_4, window_bounds = array<i64: 2, 8, 32>}]} {
    %c0_i32 = arith.constant 0 : i32
    %0 = arith.cmpi eq, %arg1, %c0_i32 : i32
    %1 = arith.extui %0 : i1 to i32
    %c0_i32_0 = arith.constant 0 : i32
    %2 = arith.cmpi ne, %1, %c0_i32_0 : i32
    scf.if %2 {
      %cst_70 = arith.constant 0.000000e+00 : f32
      %191 = vector.broadcast %cst_70 : f32 to vector<2x32xf32>
      %c0_71 = arith.constant 0 : index
      %c0_72 = arith.constant 0 : index
      %192 = vector.load %arg7[%c0_71, %c0_72] : memref<2x32xf32, #tpu.memory_space<vmem>>, vector<2x32xf32>
      tpu.vector_store %arg7[%c0_71, %c0_72], %191 {strides = array<i32>} : memref<2x32xf32, #tpu.memory_space<vmem>>, vector<2x32xf32>,
      %cst_73 = arith.constant 0.000000e+00 : f32
      %193 = vector.broadcast %cst_73 : f32 to vector<2x32xf32>
      %c0_74 = arith.constant 0 : index
      %c0_75 = arith.constant 0 : index
      %194 = vector.load %arg8[%c0_74, %c0_75] : memref<2x32xf32, #tpu.memory_space<vmem>>, vector<2x32xf32>
      tpu.vector_store %arg8[%c0_74, %c0_75], %193 {strides = array<i32>} : memref<2x32xf32, #tpu.memory_space<vmem>>, vector<2x32xf32>,
    } else {
    }
    %c0 = arith.constant 0 : index
    %c0_1 = arith.constant 0 : index
    %c0_2 = arith.constant 0 : index
    %3 = vector.load %arg2[%c0, %c0_1, %c0_2] : memref<2x8x32xf32, #tpu.memory_space<vmem>>, vector<2x8x32xf32>
    %c0_3 = arith.constant 0 : index
    %c0_4 = arith.constant 0 : index
    %4 = vector.load %arg8[%c0_3, %c0_4] : memref<2x32xf32, #tpu.memory_space<vmem>>, vector<2x32xf32>
    %5 = vector.shape_cast %4 : vector<2x32xf32> to vector<2x1x32xf32>
    %6 = vector.extract_strided_slice %3 {offsets = [0, 0, 0], sizes = [2, 7, 32], strides = [1, 1, 1]} : vector<2x8x32xf32> to vector<2x7x32xf32>
    %7 = tpu.concatenate %5, %6 in 1 : vector<2x1x32xf32>, vector<2x7x32xf32> -> vector<2x8x32xf32>
    %c0_5 = arith.constant 0 : index
    %c0_6 = arith.constant 0 : index
    %8 = vector.load %arg3[%c0_5, %c0_6] : memref<1x32xf32, #tpu.memory_space<vmem>>, vector<1x32xf32>
    %9 = vector.shape_cast %8 : vector<1x32xf32> to vector<1x1x32xf32>
    %10 = vector.broadcast %9 : vector<1x1x32xf32> to vector<2x8x32xf32>
    %11 = arith.mulf %3, %10 : vector<2x8x32xf32>
    %cst = arith.constant 1.000000e+00 : f32
    %12 = vector.broadcast %cst : f32 to vector<1x1x32xf32>
    %13 = arith.subf %12, %9 : vector<1x1x32xf32>
    %14 = vector.broadcast %13 : vector<1x1x32xf32> to vector<2x8x32xf32>
    %15 = arith.mulf %7, %14 : vector<2x8x32xf32>
    %16 = arith.addf %11, %15 : vector<2x8x32xf32>
    %17 = vector.extract_strided_slice %3 {offsets = [0, 7, 0], sizes = [2, 1, 32], strides = [1, 1, 1]} : vector<2x8x32xf32> to vector<2x1x32xf32>
    %18 = vector.shape_cast %17 : vector<2x1x32xf32> to vector<2x32xf32>
    %c0_7 = arith.constant 0 : index
    %c0_8 = arith.constant 0 : index
    %19 = vector.load %arg8[%c0_7, %c0_8] : memref<2x32xf32, #tpu.memory_space<vmem>>, vector<2x32xf32>
    tpu.vector_store %arg8[%c0_7, %c0_8], %18 {strides = array<i32>} : memref<2x32xf32, #tpu.memory_space<vmem>>, vector<2x32xf32>,
    %20 = vector.shape_cast %16 : vector<2x8x32xf32> to vector<16x32xf32>
    %c0_9 = arith.constant 0 : index
    %c0_10 = arith.constant 0 : index
    %21 = vector.load %arg4[%c0_9, %c0_10] : memref<32x96xf32, #tpu.memory_space<vmem>>, vector<32x96xf32>
    %cst_11 = arith.constant dense<0.000000e+00> : vector<16x96xf32>
    %22 = tpu.matmul %20, %21, %cst_11 {dimension_numbers = #tpu.dot_dimension_numbers<[1], [0], [0], [1], [0, 0, 1, 1], [], []>} : vector<16x32xf32>, vector<32x96xf32>, vector<16x96xf32> -> vector<16x96xf32>
    %23 = vector.extract_strided_slice %22 {offsets = [0, 0], sizes = [16, 64], strides = [1, 1]} : vector<16x96xf32> to vector<16x64xf32>
    %cst_12 = arith.constant 0.000000e+00 : f32
    %24 = vector.broadcast %cst_12 : f32 to vector<16x64xf32>
    %25 = arith.maximumf %23, %24 : vector<16x64xf32>
    %26 = arith.mulf %25, %25 : vector<16x64xf32>
    %27 = vector.extract_strided_slice %22 {offsets = [0, 64], sizes = [16, 32], strides = [1, 1]} : vector<16x96xf32> to vector<16x32xf32>
    %28 = arith.negf %27 : vector<16x32xf32>
    %29 = math.exp %28 : vector<16x32xf32>
    %cst_13 = arith.constant 1.000000e+00 : f32
    %30 = vector.broadcast %cst_13 : f32 to vector<16x32xf32>
    %31 = arith.addf %30, %29 : vector<16x32xf32>
    %32 = arith.divf %30, %31 : vector<16x32xf32>
    %c0_14 = arith.constant 0 : index
    %c0_15 = arith.constant 0 : index
    %33 = vector.load %arg5[%c0_14, %c0_15] : memref<64x32xf32, #tpu.memory_space<vmem>>, vector<64x32xf32>
    %cst_16 = arith.constant dense<0.000000e+00> : vector<16x32xf32>
    %34 = tpu.matmul %26, %33, %cst_16 {dimension_numbers = #tpu.dot_dimension_numbers<[1], [0], [0], [1], [0, 0, 1, 1], [], []>} : vector<16x64xf32>, vector<64x32xf32>, vector<16x32xf32> -> vector<16x32xf32>
    %35 = arith.mulf %32, %34 : vector<16x32xf32>
    %36 = vector.shape_cast %35 : vector<16x32xf32> to vector<2x8x32xf32>
    %c0_17 = arith.constant 0 : index
    %c0_18 = arith.constant 0 : index
    %37 = vector.load %arg7[%c0_17, %c0_18] : memref<2x32xf32, #tpu.memory_space<vmem>>, vector<2x32xf32>
    %cst_19 = arith.constant 2.000000e-01 : f32
    %38 = vector.broadcast %cst_19 : f32 to vector<2x32xf32>
    %39 = arith.cmpf ogt, %37, %38 : vector<2x32xf32>
    %40 = arith.extui %39 : vector<2x32xi1> to vector<2x32xi32>
    %41 = arith.sitofp %40 : vector<2x32xi32> to vector<2x32xf32>
    %cst_20 = arith.constant 3.000000e-01 : f32
    %42 = vector.broadcast %cst_20 : f32 to vector<2x32xf32>
    %43 = arith.mulf %42, %37 : vector<2x32xf32>
    %44 = vector.extract_strided_slice %36 {offsets = [0, 0, 0], sizes = [2, 1, 32], strides = [1, 1, 1]} : vector<2x8x32xf32> to vector<2x1x32xf32>
    %45 = vector.shape_cast %44 : vector<2x1x32xf32> to vector<2x32xf32>
    %46 = arith.addf %43, %45 : vector<2x32xf32>
    %cst_21 = arith.constant 2.000000e-01 : f32
    %47 = vector.broadcast %cst_21 : f32 to vector<2x32xf32>
    %48 = arith.mulf %41, %47 : vector<2x32xf32>
    %49 = arith.subf %46, %48 : vector<2x32xf32>
    %cst_22 = arith.constant 2.000000e-01 : f32
    %50 = vector.broadcast %cst_22 : f32 to vector<2x32xf32>
    %51 = arith.cmpf ogt, %49, %50 : vector<2x32xf32>
    %52 = arith.extui %51 : vector<2x32xi1> to vector<2x32xi32>
    %53 = arith.sitofp %52 : vector<2x32xi32> to vector<2x32xf32>
    %c0_23 = arith.constant 0 : index
    %c0_24 = arith.constant 0 : index
    %c0_25 = arith.constant 0 : index
    %54 = vector.load %arg6[%c0_23, %c0_24, %c0_25] : memref<2x8x32xf32, #tpu.memory_space<vmem>>, vector<2x1x32xf32>
    %55 = vector.shape_cast %54 : vector<2x1x32xf32> to vector<2x32xf32>
    %56 = vector.shape_cast %53 : vector<2x32xf32> to vector<2x1x32xf32>
    tpu.vector_store %arg6[%c0_23, %c0_24, %c0_25], %56 {strides = array<i32>} : memref<2x8x32xf32, #tpu.memory_space<vmem>>, vector<2x1x32xf32>,
    %cst_26 = arith.constant 2.000000e-01 : f32
    %57 = vector.broadcast %cst_26 : f32 to vector<2x32xf32>
    %58 = arith.cmpf ogt, %49, %57 : vector<2x32xf32>
    %59 = arith.extui %58 : vector<2x32xi1> to vector<2x32xi32>
    %60 = arith.sitofp %59 : vector<2x32xi32> to vector<2x32xf32>
    %cst_27 = arith.constant 3.000000e-01 : f32
    %61 = vector.broadcast %cst_27 : f32 to vector<2x32xf32>
    %62 = arith.mulf %61, %49 : vector<2x32xf32>
    %63 = vector.extract_strided_slice %36 {offsets = [0, 1, 0], sizes = [2, 1, 32], strides = [1, 1, 1]} : vector<2x8x32xf32> to vector<2x1x32xf32>
    %64 = vector.shape_cast %63 : vector<2x1x32xf32> to vector<2x32xf32>
    %65 = arith.addf %62, %64 : vector<2x32xf32>
    %cst_28 = arith.constant 2.000000e-01 : f32
    %66 = vector.broadcast %cst_28 : f32 to vector<2x32xf32>
    %67 = arith.mulf %60, %66 : vector<2x32xf32>
    %68 = arith.subf %65, %67 : vector<2x32xf32>
    %cst_29 = arith.constant 2.000000e-01 : f32
    %69 = vector.broadcast %cst_29 : f32 to vector<2x32xf32>
    %70 = arith.cmpf ogt, %68, %69 : vector<2x32xf32>
    %71 = arith.extui %70 : vector<2x32xi1> to vector<2x32xi32>
    %72 = arith.sitofp %71 : vector<2x32xi32> to vector<2x32xf32>
    %c0_30 = arith.constant 0 : index
    %c1 = arith.constant 1 : index
    %c0_31 = arith.constant 0 : index
    %73 = vector.load %arg6[%c0_30, %c1, %c0_31] : memref<2x8x32xf32, #tpu.memory_space<vmem>>, vector<2x1x32xf32>
    %74 = vector.shape_cast %73 : vector<2x1x32xf32> to vector<2x32xf32>
    %75 = vector.shape_cast %72 : vector<2x32xf32> to vector<2x1x32xf32>
    tpu.vector_store %arg6[%c0_30, %c1, %c0_31], %75 {strides = array<i32>} : memref<2x8x32xf32, #tpu.memory_space<vmem>>, vector<2x1x32xf32>,
    %cst_32 = arith.constant 2.000000e-01 : f32
    %76 = vector.broadcast %cst_32 : f32 to vector<2x32xf32>
    %77 = arith.cmpf ogt, %68, %76 : vector<2x32xf32>
    %78 = arith.extui %77 : vector<2x32xi1> to vector<2x32xi32>
    %79 = arith.sitofp %78 : vector<2x32xi32> to vector<2x32xf32>
    %cst_33 = arith.constant 3.000000e-01 : f32
    %80 = vector.broadcast %cst_33 : f32 to vector<2x32xf32>
    %81 = arith.mulf %80, %68 : vector<2x32xf32>
    %82 = vector.extract_strided_slice %36 {offsets = [0, 2, 0], sizes = [2, 1, 32], strides = [1, 1, 1]} : vector<2x8x32xf32> to vector<2x1x32xf32>
    %83 = vector.shape_cast %82 : vector<2x1x32xf32> to vector<2x32xf32>
    %84 = arith.addf %81, %83 : vector<2x32xf32>
    %cst_34 = arith.constant 2.000000e-01 : f32
    %85 = vector.broadcast %cst_34 : f32 to vector<2x32xf32>
    %86 = arith.mulf %79, %85 : vector<2x32xf32>
    %87 = arith.subf %84, %86 : vector<2x32xf32>
    %cst_35 = arith.constant 2.000000e-01 : f32
    %88 = vector.broadcast %cst_35 : f32 to vector<2x32xf32>
    %89 = arith.cmpf ogt, %87, %88 : vector<2x32xf32>
    %90 = arith.extui %89 : vector<2x32xi1> to vector<2x32xi32>
    %91 = arith.sitofp %90 : vector<2x32xi32> to vector<2x32xf32>
    %c0_36 = arith.constant 0 : index
    %c2 = arith.constant 2 : index
    %c0_37 = arith.constant 0 : index
    %92 = vector.load %arg6[%c0_36, %c2, %c0_37] : memref<2x8x32xf32, #tpu.memory_space<vmem>>, vector<2x1x32xf32>
    %93 = vector.shape_cast %92 : vector<2x1x32xf32> to vector<2x32xf32>
    %94 = vector.shape_cast %91 : vector<2x32xf32> to vector<2x1x32xf32>
    tpu.vector_store %arg6[%c0_36, %c2, %c0_37], %94 {strides = array<i32>} : memref<2x8x32xf32, #tpu.memory_space<vmem>>, vector<2x1x32xf32>,
    %cst_38 = arith.constant 2.000000e-01 : f32
    %95 = vector.broadcast %cst_38 : f32 to vector<2x32xf32>
    %96 = arith.cmpf ogt, %87, %95 : vector<2x32xf32>
    %97 = arith.extui %96 : vector<2x32xi1> to vector<2x32xi32>
    %98 = arith.sitofp %97 : vector<2x32xi32> to vector<2x32xf32>
    %cst_39 = arith.constant 3.000000e-01 : f32
    %99 = vector.broadcast %cst_39 : f32 to vector<2x32xf32>
    %100 = arith.mulf %99, %87 : vector<2x32xf32>
    %101 = vector.extract_strided_slice %36 {offsets = [0, 3, 0], sizes = [2, 1, 32], strides = [1, 1, 1]} : vector<2x8x32xf32> to vector<2x1x32xf32>
    %102 = vector.shape_cast %101 : vector<2x1x32xf32> to vector<2x32xf32>
    %103 = arith.addf %100, %102 : vector<2x32xf32>
    %cst_40 = arith.constant 2.000000e-01 : f32
    %104 = vector.broadcast %cst_40 : f32 to vector<2x32xf32>
    %105 = arith.mulf %98, %104 : vector<2x32xf32>
    %106 = arith.subf %103, %105 : vector<2x32xf32>
    %cst_41 = arith.constant 2.000000e-01 : f32
    %107 = vector.broadcast %cst_41 : f32 to vector<2x32xf32>
    %108 = arith.cmpf ogt, %106, %107 : vector<2x32xf32>
    %109 = arith.extui %108 : vector<2x32xi1> to vector<2x32xi32>
    %110 = arith.sitofp %109 : vector<2x32xi32> to vector<2x32xf32>
    %c0_42 = arith.constant 0 : index
    %c3 = arith.constant 3 : index
    %c0_43 = arith.constant 0 : index
    %111 = vector.load %arg6[%c0_42, %c3, %c0_43] : memref<2x8x32xf32, #tpu.memory_space<vmem>>, vector<2x1x32xf32>
    %112 = vector.shape_cast %111 : vector<2x1x32xf32> to vector<2x32xf32>
    %113 = vector.shape_cast %110 : vector<2x32xf32> to vector<2x1x32xf32>
    tpu.vector_store %arg6[%c0_42, %c3, %c0_43], %113 {strides = array<i32>} : memref<2x8x32xf32, #tpu.memory_space<vmem>>, vector<2x1x32xf32>,
    %cst_44 = arith.constant 2.000000e-01 : f32
    %114 = vector.broadcast %cst_44 : f32 to vector<2x32xf32>
    %115 = arith.cmpf ogt, %106, %114 : vector<2x32xf32>
    %116 = arith.extui %115 : vector<2x32xi1> to vector<2x32xi32>
    %117 = arith.sitofp %116 : vector<2x32xi32> to vector<2x32xf32>
    %cst_45 = arith.constant 3.000000e-01 : f32
    %118 = vector.broadcast %cst_45 : f32 to vector<2x32xf32>
    %119 = arith.mulf %118, %106 : vector<2x32xf32>
    %120 = vector.extract_strided_slice %36 {offsets = [0, 4, 0], sizes = [2, 1, 32], strides = [1, 1, 1]} : vector<2x8x32xf32> to vector<2x1x32xf32>
    %121 = vector.shape_cast %120 : vector<2x1x32xf32> to vector<2x32xf32>
    %122 = arith.addf %119, %121 : vector<2x32xf32>
    %cst_46 = arith.constant 2.000000e-01 : f32
    %123 = vector.broadcast %cst_46 : f32 to vector<2x32xf32>
    %124 = arith.mulf %117, %123 : vector<2x32xf32>
    %125 = arith.subf %122, %124 : vector<2x32xf32>
    %cst_47 = arith.constant 2.000000e-01 : f32
    %126 = vector.broadcast %cst_47 : f32 to vector<2x32xf32>
    %127 = arith.cmpf ogt, %125, %126 : vector<2x32xf32>
    %128 = arith.extui %127 : vector<2x32xi1> to vector<2x32xi32>
    %129 = arith.sitofp %128 : vector<2x32xi32> to vector<2x32xf32>
    %c0_48 = arith.constant 0 : index
    %c4 = arith.constant 4 : index
    %c0_49 = arith.constant 0 : index
    %130 = vector.load %arg6[%c0_48, %c4, %c0_49] : memref<2x8x32xf32, #tpu.memory_space<vmem>>, vector<2x1x32xf32>
    %131 = vector.shape_cast %130 : vector<2x1x32xf32> to vector<2x32xf32>
    %132 = vector.shape_cast %129 : vector<2x32xf32> to vector<2x1x32xf32>
    tpu.vector_store %arg6[%c0_48, %c4, %c0_49], %132 {strides = array<i32>} : memref<2x8x32xf32, #tpu.memory_space<vmem>>, vector<2x1x32xf32>,
    %cst_50 = arith.constant 2.000000e-01 : f32
    %133 = vector.broadcast %cst_50 : f32 to vector<2x32xf32>
    %134 = arith.cmpf ogt, %125, %133 : vector<2x32xf32>
    %135 = arith.extui %134 : vector<2x32xi1> to vector<2x32xi32>
    %136 = arith.sitofp %135 : vector<2x32xi32> to vector<2x32xf32>
    %cst_51 = arith.constant 3.000000e-01 : f32
    %137 = vector.broadcast %cst_51 : f32 to vector<2x32xf32>
    %138 = arith.mulf %137, %125 : vector<2x32xf32>
    %139 = vector.extract_strided_slice %36 {offsets = [0, 5, 0], sizes = [2, 1, 32], strides = [1, 1, 1]} : vector<2x8x32xf32> to vector<2x1x32xf32>
    %140 = vector.shape_cast %139 : vector<2x1x32xf32> to vector<2x32xf32>
    %141 = arith.addf %138, %140 : vector<2x32xf32>
    %cst_52 = arith.constant 2.000000e-01 : f32
    %142 = vector.broadcast %cst_52 : f32 to vector<2x32xf32>
    %143 = arith.mulf %136, %142 : vector<2x32xf32>
    %144 = arith.subf %141, %143 : vector<2x32xf32>
    %cst_53 = arith.constant 2.000000e-01 : f32
    %145 = vector.broadcast %cst_53 : f32 to vector<2x32xf32>
    %146 = arith.cmpf ogt, %144, %145 : vector<2x32xf32>
    %147 = arith.extui %146 : vector<2x32xi1> to vector<2x32xi32>
    %148 = arith.sitofp %147 : vector<2x32xi32> to vector<2x32xf32>
    %c0_54 = arith.constant 0 : index
    %c5 = arith.constant 5 : index
    %c0_55 = arith.constant 0 : index
    %149 = vector.load %arg6[%c0_54, %c5, %c0_55] : memref<2x8x32xf32, #tpu.memory_space<vmem>>, vector<2x1x32xf32>
    %150 = vector.shape_cast %149 : vector<2x1x32xf32> to vector<2x32xf32>
    %151 = vector.shape_cast %148 : vector<2x32xf32> to vector<2x1x32xf32>
    tpu.vector_store %arg6[%c0_54, %c5, %c0_55], %151 {strides = array<i32>} : memref<2x8x32xf32, #tpu.memory_space<vmem>>, vector<2x1x32xf32>,
    %cst_56 = arith.constant 2.000000e-01 : f32
    %152 = vector.broadcast %cst_56 : f32 to vector<2x32xf32>
    %153 = arith.cmpf ogt, %144, %152 : vector<2x32xf32>
    %154 = arith.extui %153 : vector<2x32xi1> to vector<2x32xi32>
    %155 = arith.sitofp %154 : vector<2x32xi32> to vector<2x32xf32>
    %cst_57 = arith.constant 3.000000e-01 : f32
    %156 = vector.broadcast %cst_57 : f32 to vector<2x32xf32>
    %157 = arith.mulf %156, %144 : vector<2x32xf32>
    %158 = vector.extract_strided_slice %36 {offsets = [0, 6, 0], sizes = [2, 1, 32], strides = [1, 1, 1]} : vector<2x8x32xf32> to vector<2x1x32xf32>
    %159 = vector.shape_cast %158 : vector<2x1x32xf32> to vector<2x32xf32>
    %160 = arith.addf %157, %159 : vector<2x32xf32>
    %cst_58 = arith.constant 2.000000e-01 : f32
    %161 = vector.broadcast %cst_58 : f32 to vector<2x32xf32>
    %162 = arith.mulf %155, %161 : vector<2x32xf32>
    %163 = arith.subf %160, %162 : vector<2x32xf32>
    %cst_59 = arith.constant 2.000000e-01 : f32
    %164 = vector.broadcast %cst_59 : f32 to vector<2x32xf32>
    %165 = arith.cmpf ogt, %163, %164 : vector<2x32xf32>
    %166 = arith.extui %165 : vector<2x32xi1> to vector<2x32xi32>
    %167 = arith.sitofp %166 : vector<2x32xi32> to vector<2x32xf32>
    %c0_60 = arith.constant 0 : index
    %c6 = arith.constant 6 : index
    %c0_61 = arith.constant 0 : index
    %168 = vector.load %arg6[%c0_60, %c6, %c0_61] : memref<2x8x32xf32, #tpu.memory_space<vmem>>, vector<2x1x32xf32>
    %169 = vector.shape_cast %168 : vector<2x1x32xf32> to vector<2x32xf32>
    %170 = vector.shape_cast %167 : vector<2x32xf32> to vector<2x1x32xf32>
    tpu.vector_store %arg6[%c0_60, %c6, %c0_61], %170 {strides = array<i32>} : memref<2x8x32xf32, #tpu.memory_space<vmem>>, vector<2x1x32xf32>,
    %cst_62 = arith.constant 2.000000e-01 : f32
    %171 = vector.broadcast %cst_62 : f32 to vector<2x32xf32>
    %172 = arith.cmpf ogt, %163, %171 : vector<2x32xf32>
    %173 = arith.extui %172 : vector<2x32xi1> to vector<2x32xi32>
    %174 = arith.sitofp %173 : vector<2x32xi32> to vector<2x32xf32>
    %cst_63 = arith.constant 3.000000e-01 : f32
    %175 = vector.broadcast %cst_63 : f32 to vector<2x32xf32>
    %176 = arith.mulf %175, %163 : vector<2x32xf32>
    %177 = vector.extract_strided_slice %36 {offsets = [0, 7, 0], sizes = [2, 1, 32], strides = [1, 1, 1]} : vector<2x8x32xf32> to vector<2x1x32xf32>
    %178 = vector.shape_cast %177 : vector<2x1x32xf32> to vector<2x32xf32>
    %179 = arith.addf %176, %178 : vector<2x32xf32>
    %cst_64 = arith.constant 2.000000e-01 : f32
    %180 = vector.broadcast %cst_64 : f32 to vector<2x32xf32>
    %181 = arith.mulf %174, %180 : vector<2x32xf32>
    %182 = arith.subf %179, %181 : vector<2x32xf32>
    %cst_65 = arith.constant 2.000000e-01 : f32
    %183 = vector.broadcast %cst_65 : f32 to vector<2x32xf32>
    %184 = arith.cmpf ogt, %182, %183 : vector<2x32xf32>
    %185 = arith.extui %184 : vector<2x32xi1> to vector<2x32xi32>
    %186 = arith.sitofp %185 : vector<2x32xi32> to vector<2x32xf32>
    %c0_66 = arith.constant 0 : index
    %c7 = arith.constant 7 : index
    %c0_67 = arith.constant 0 : index
    %187 = vector.load %arg6[%c0_66, %c7, %c0_67] : memref<2x8x32xf32, #tpu.memory_space<vmem>>, vector<2x1x32xf32>
    %188 = vector.shape_cast %187 : vector<2x1x32xf32> to vector<2x32xf32>
    %189 = vector.shape_cast %186 : vector<2x32xf32> to vector<2x1x32xf32>
    tpu.vector_store %arg6[%c0_66, %c7, %c0_67], %189 {strides = array<i32>} : memref<2x8x32xf32, #tpu.memory_space<vmem>>, vector<2x1x32xf32>,
    %c0_68 = arith.constant 0 : index
    %c0_69 = arith.constant 0 : index
    %190 = vector.load %arg7[%c0_68, %c0_69] : memref<2x32xf32, #tpu.memory_space<vmem>>, vector<2x32xf32>
    tpu.vector_store %arg7[%c0_68, %c0_69], %182 {strides = array<i32>} : memref<2x32xf32, #tpu.memory_space<vmem>>, vector<2x32xf32>,
    return
  }
  func.func @transform_0(%arg0: i32, %arg1: i32) -> (i32, i32, i32) {
    %c0_i32 = arith.constant 0 : i32
    %c0_i32_0 = arith.constant 0 : i32
    return %arg0, %arg1, %c0_i32 : i32, i32, i32
  }
  func.func @transform_1(%arg0: i32, %arg1: i32) -> (i32, i32) {
    %c0_i32 = arith.constant 0 : i32
    %c0_i32_0 = arith.constant 0 : i32
    %c0_i32_1 = arith.constant 0 : i32
    return %c0_i32, %c0_i32_0 : i32, i32
  }
  func.func @transform_2(%arg0: i32, %arg1: i32) -> (i32, i32) {
    %c0_i32 = arith.constant 0 : i32
    %c0_i32_0 = arith.constant 0 : i32
    %c0_i32_1 = arith.constant 0 : i32
    return %c0_i32, %c0_i32_0 : i32, i32
  }
  func.func @transform_3(%arg0: i32, %arg1: i32) -> (i32, i32) {
    %c0_i32 = arith.constant 0 : i32
    %c0_i32_0 = arith.constant 0 : i32
    %c0_i32_1 = arith.constant 0 : i32
    return %c0_i32, %c0_i32_0 : i32, i32
  }
  func.func @transform_4(%arg0: i32, %arg1: i32) -> (i32, i32, i32) {
    %c0_i32 = arith.constant 0 : i32
    %c0_i32_0 = arith.constant 0 : i32
    return %arg0, %arg1, %c0_i32 : i32, i32, i32
  }
}

</mosaic_0001>

<bundles_post_ra>
// kernel: tpu_custom_call.1
= control target key start
LH: loop header
LB: loop body
LE: loop exit
PB: predicated region body
PF: predicated region fallthrough
CT: control target
= control target key end

     0   :  { %9 = vsyncpa [#allocation6], 0  ;;  %s1269_s0 = inlined_call_operand.vmem [shape: f32[4,16,32], index: 0, kind: input, shape index: {}]   ;;  %s1270_s1 = inlined_call_operand.hbm [shape: f32[1,32], index: 1, kind: input, shape index: {}]   ;;  %s1271_s2 = inlined_call_operand.vmem [shape: f32[32,96], index: 2, kind: input, shape index: {}]   ;;  %s1272_s3 = inlined_call_operand.vmem [shape: f32[64,32], index: 3, kind: input, shape index: {}]   ;;  %s1273_s4 = inlined_call_operand.hbm [shape: f32[4,16,32], index: 4, kind: output, shape index: {}]  }
   0x1   :  { %10 = vsyncpa [#allocation7], 0 }
   0x2   :  { %12 = vsyncpa [#allocation7 + $0x1], 0  ;;  %s1008_s15 = smov 0   ;;  %s1010_s16 = smov 0  }
   0x3   :  { %s1012_s17 = smov 0   ;;  %s1014_s18 = smov 0  }
   0x4   :  { %s1016_s19 = smov 0   ;;  %s1018_s20 = smov 0  }
   0x5   :  { %s1020_s21 = smov 0   ;;  %s1022_s22 = smov 0  }
   0x6 LB: > { %s700_s23 = sadd.s32 4294967295, %s974_s22   ;;  %s701_s24 = sadd.s32 4294967294, %s974_s22   ;;  %s974_s22 = sphi %s1022_s22, %s18_s22   ;;  %s970_s21 = sphi %s1020_s21, %s1285_s21   ;;  %s966_s20 = sphi %s1018_s20, %s1284_s20   ;;  %s962_s19 = sphi %s1016_s19, %s1283_s19   ;;  %s958_s18 = sphi %s1014_s18, %s1282_s18   ;;  %s954_s17 = sphi %s1012_s17, %s1281_s17   ;;  %s950_s16 = sphi %s1010_s16, %s1280_s16   ;;  %s946_s15 = sphi %s1008_s15, %s1279_s15  }
   0x7   : > { %s27_s25 = sadd.s32 1, %s966_s20  ;;  %s30_s26 = sadd.s32 1, %s970_s21 }
   0x8   : > { %p28_p0 = scmp.ge.s32.totalorder %s27_s25, 2  ;;  %s39_s27 = sadd.s32 1, %s954_s17 }
   0x9   : > { %p46_p1 = scmp.ne.s32.totalorder %s954_s17, %s950_s16  ;;  %p47_p2 = scmp.eq.s32.totalorder %s974_s22, 0 }
   0xa   : > { %s1287_s25 = smov (%p28_p0, %s27_s25), 0  ;;  %s1289_s26 = smov (!%p28_p0, %s30_s26), %s970_s21 }
   0xb   : > { %s35_s28 = ssub.s32 %s966_s20, %s1287_s25  ;;  %p1061_p3 = por %p47_p2, %p46_p1 }
   0xc   : > { %p32_p4 = scmp.ge.s32.totalorder %s1289_s26, 2  ;;  %p141_p5 = scmp.eq.s32.totalorder %s700_s23, 3 }
   0xd   : > { %p146_p6 = scmp.ne.s32.totalorder %s950_s16, %s946_s15  ;;  %p147_p7 = scmp.eq.s32.totalorder %s701_s24, 3 }
   0xe   : > { %s1291_s26 = smov (%p32_p4, %s1289_s26), 0  ;;  %p1069_p8 = por %p141_p5, %p46_p1 }
   0xf   : > { %p1073_p9 = por %p147_p7, %p146_p6  ;;  %s34_s6 = ssub.s32 %s970_s21, %s1291_s26 }
  0x10   : > { %p702_p10 = scmp.ge.s32.totalorder %s974_s22, 1  ;;  %s36_s7 = sor.u32 %s35_s28, %s34_s6 }
  0x11   : > { %p154_p11 = scmp.lt.s32.totalorder %s974_s22, 5  ;;  %p37_p12 = scmp.eq.s32.totalorder %s36_s7, 0 }
  0x12   : > { %p1085_p0 = scmp.eq.s32.totalorder %s700_s23, 0  ;;  %s166_s13 = sshll.u32 %s1270_s1, 4  ;;  %s167_s13 = int_to_ptr.hbm [resolvable:$true] %s166_s13 }
  0x13   : > { %p1081_p13 = pnand %p702_p10, %p154_p11  ;;  %s976_s14 = smov [#allocation5]  }
  0x14   : > { %s1090_s10 = scalar_select %p37_p12, %s954_s17, %s39_s27  }
  0x15   : > { %p755_p1 = pneg %p1081_p13  ;;  %s168_s24 = sshll.u32 %s976_s14, 4  ;;  %s169_s24 = int_to_ptr.vmem [resolvable:$true] %s168_s24 }
  0x16   : > { %p704_p4 = scmp.ge.s32.totalorder %s974_s22, 4 }
  0x17   : > { %p756_p2 = pnand %p1085_p0, %p755_p1 }
  0x18   : > { %181 = sbr.rel (%p704_p4) target bundleno = 37 (0x25), region = 28 }
  0x19   : > { %758 = dma.hbm_to_vmem [thread:$0]  (!%p756_p2), %s167_s13, 16, %s169_s24, [#allocation6]  }
  0x1d   : > { %184 = sbr.rel (!%p1061_p3) target bundleno = 37 (0x25), region = 32  ;;  %s186_s23 = sand.u32 (%p1061_p3), 1, %s954_s17  }
  0x1e   : > { %s735_s27 = sshll.u32 (%p1061_p3), %s970_s21, 2  ;;  %s705_s28 = sshll.u32 (%p1061_p3), %s186_s23, 4 }
  0x1f   : > { %s191_s6 = sadd.s32 (%p1061_p3), %s966_s20, %s735_s27  ;;  %s188_s13 = scalar_lea.vmem (%p1061_p3), [#allocation4], %s705_s28 }
  0x20   : > { %s708_s7 = sshll.u32 (%p1061_p3), %s191_s6, 3 }
  0x21   : > { %s193_s14 = scalar_lea.vmem (%p1061_p3), %s1269_s0, %s708_s7 }
  0x22   : > { %v224_v0 = vld [vmem:[%s193_s14] sm:$0xff]  ;;  %v226_v1 = vld [vmem:[%s193_s14 + $0x10] sm:$0xff] }
  0x23   : > { %225 = vst [vmem:[%s188_s13] sm:$0xff] %v224_v0 }
  0x24   : > { %227 = vst [vmem:[%s188_s13 + $0x8] sm:$0xff] %v226_v1 }
  0x25 PF: > { %236 = sbr.rel (%p1081_p13) target bundleno = 633 (0x279), region = 70  ;;  %s239_s29 = sand.u32 (!%p1081_p13), 1, %s950_s16  }
  0x26   : > { %s1113_s24 = sshll.u32 (!%p1081_p13), %s239_s29, 4 }
  0x27   : > { %s241_s23 = scalar_lea.vmem (!%p1081_p13), [#allocation4], %s1113_s24 }
  0x2a   : > { %937 = dma.done.wait (%p1085_p0), [#allocation6], 16  }
  0x2b   : > { %939 = vsyncadd (%p1085_p0), [#allocation6], 4294967280  ;;  %s1121_s27 = scalar_lea.vmem [#allocation8], %s1113_s24  ;;  %p713_p3 = scmp.ne.s32.totalorder %s958_s18, 0 }
  0x2d   : > { %274 = sbr.rel (%p713_p3) target bundleno = 53 (0x35), region = 82 }
  0x32   : > { %vm275_vm0 = vcmask 254976   ;;  %v977_v2 = vmov 0.0  }
  0x33   : > { %276 = vst.msk [vmem:[#allocation2] sm:$0x3] %vm275_vm0, %v977_v2 }
  0x34   : > { %277 = vst.msk [vmem:[#allocation3] sm:$0x3] %vm275_vm0, %v977_v2 }
  0x35 PF: > { %v315_v3 = vld [vmem:[%s1271_s2 + $0x18] sm:$0xff]  ;;  %v314_v4 = vld [vmem:[%s1271_s2 + $0x10] sm:$0xff]  ;;  %v313_v5 = vld [vmem:[%s1271_s2 + $0x8] sm:$0xff]  ;;  %vm290_vm1 = vcmask 1040384   ;;  %vm308_vm2 = vcmask 261127   ;;  %vm310_vm3 = vcmask 253952  }
  0x36   : > { %737 = vmatpush.msra.mxu3 %v315_v3  ;;  %335 = vmatpush.msra.mxu0 %v315_v3  ;;  %v279_v6 = vld [vmem:[%s241_s23 + $0x8] sm:$0xff]  ;;  %v293_v10 = vld [vmem:[#allocation5] sm:$0x1]  ;;  %vm316_vm4 = vcmask 261120   ;;  %vm396_vm5 = vcmask 523264   ;;  %s978_s6 = smov 64  }
  0x37   : > { %v287_v9 = vrot.slane %v279_v6, 7  ;;  %v837_v11 = vld [vmem:[#allocation5] ss:$0 sm:$0xff]  ;;  %v299_v12 = vsub.f32 1.0, %v293_v10  ;;  %v395_v14 = vld [vmem:[%s1272_s3 + $0x38] sm:$0xff]  ;;  %v394_v15 = vld [vmem:[%s1272_s3 + $0x30] sm:$0xff] }
  0x38   : > { %738 = vmatpush.msra.mxu3 %v314_v4  ;;  %336 = vmatpush.msra.mxu0 %v314_v4  ;;  %v278_v13 = vld [vmem:[%s241_s23] sm:$0xff]  ;;  %v298_v19 = vmul.f32 %v837_v11, %v279_v6  ;;  %vm444_vm14 = vcmask 1041409   ;;  %s736_s7 = sshll.u32 %s962_s19, 2  ;;  %s602_s14 = sshll.u32 %s1121_s27, 4  ;;  %s603_s14 = int_to_ptr.vmem [resolvable:$true] %s602_s14 }
  0x39   : > { %v312_v16 = vld [vmem:[%s1271_s2] sm:$0xff]  ;;  %v286_v18 = vrot.slane %v278_v13, 7  ;;  %741 = vmatpush.msra.mxu2 %v395_v14  ;;  %v301_v20 = vperm.slane %v299_v12, 0  ;;  %v297_v21 = vmul.f32 %v837_v11, %v278_v13  ;;  %v393_v22 = vld [vmem:[%s1272_s3 + $0x28] sm:$0xff]  ;;  %411 = vmatpush.msra.mxu1 %v395_v14  ;;  %v391_v29 = vld [vmem:[%s1272_s3 + $0x18] sm:$0xff]  ;;  %s599_s9 = sadd.s32 %s958_s18, %s736_s7  ;;  %s588_s24 = scalar_lea.sflag [#allocation7], %s239_s29 }
  0x3a   : > { %739 = vmatpush.msra.mxu3 %v313_v5  ;;  %337 = vmatpush.msra.mxu0 %v313_v5  ;;  %v392_v26 = vld [vmem:[%s1272_s3 + $0x20] sm:$0xff]  ;;  %v390_v30 = vld [vmem:[%s1272_s3 + $0x10] sm:$0xff]  ;;  %v389_v31 = vld [vmem:[%s1272_s3 + $0x8] sm:$0xff]  ;;  %s732_s11 = sshll.u32 %s599_s9, 3  ;;  %s896_s7 = scalar_lea.hbm %s1273_s4, 64 }
  0x3b   : > { %v280_v7 = vld [vmem:[#allocation3] sm:$0x3]  ;;  %742 = vmatpush.msra.mxu2 %v394_v15  ;;  %412 = vmatpush.msra.mxu1 %v394_v15  ;;  %s601_s18 = scalar_lea.hbm %s1273_s4, %s732_s11 }
  0x3c   : > { %v282_v8 = vrot.slane %v280_v7, 1  ;;  %311 = vst.msk [vmem:[#allocation3 + $0x1] sm:$0x1] %vm310_vm3, %v287_v9  ;;  %v291_v23 = vsel %vm290_vm1, %v280_v7, %v286_v18  ;;  %740 = vmatpush.msra.mxu3 %v312_v16  ;;  %338 = vmatpush.msra.mxu0 %v312_v16  ;;  %v388_v32 = vld [vmem:[%s1272_s3] sm:$0xff]  ;;  %s604_s13 = sshll.u32 %s601_s18, 4  ;;  %s605_s13 = int_to_ptr.hbm [resolvable:$true] %s604_s13 }
  0x3d   : > { %309 = vst.msk [vmem:[#allocation3 - $0x7] sm:$0x80] %vm308_vm2, %v278_v13  ;;  %v303_v25 = vmul.f32 %v301_v20, %v291_v23  ;;  %743 = vmatpush.msra.mxu2 %v393_v22  ;;  %413 = vmatpush.msra.mxu1 %v393_v22  ;;  %s890_s8 = sshra.s32 %s605_s13, 4  ;;  %s891_s8 = int_to_ptr.hbm [resolvable:$true] %s890_s8 }
  0x3e   : > { %v292_v17 = vsel %vm290_vm1, %v282_v8, %v287_v9  ;;  %s892_s28 = scalar_lea.hbm %s891_s8, 16  ;;  %p897_p10 = scmp.lt.s32.totalorder %s891_s8, %s1273_s4 }
  0x3f   : > { %v304_v24 = vmul.f32 %v301_v20, %v292_v17  ;;  %v305_v28 = vadd.f32 %v303_v25, %v297_v21  ;;  %744 = vmatpush.msra.mxu2 %v392_v26  ;;  %414 = vmatpush.msra.mxu1 %v392_v26  ;;  %p893_p5 = scmp.ne.s32.totalorder %s891_s8, %s892_s28  ;;  %p898_p11 = scmp.lt.s32.totalorder %s896_s7, %s892_s28 }
  0x41   : > { %v306_v27 = vadd.f32 %v304_v24, %v298_v19  ;;  %714 = vmatmul.msk.f32.vlgmr.msra.gmra.mxu0 %vm316_vm4, %v305_v28  ;;  %745 = vmatpush.msra.mxu2 %v391_v29  ;;  %p894_p6 = pnand %p893_p5, %p1069_p8  ;;  %p899_p12 = por %p898_p11, %p897_p10 }
  0x42   : > { %415 = vmatpush.msra.mxu1 %v391_v29  ;;  %v436_v29 = vld [vmem:[#allocation2] sm:$0x3] }
  0x43   : > { %715 = vmatmul.msk.f32.vlgmr.msra.gmra.mxu3 %vm316_vm4, %v306_v27  ;;  %746 = vmatpush.msra.mxu2 %v390_v30  ;;  %vm437_vm15 = vcmp.gt.f32.partialorder %v436_v29, 0.2  ;;  %p895_p7 = pneg %p894_p6 }
  0x44   : > { %416 = vmatpush.msra.mxu1 %v390_v30  ;;  %v979_v30 = vmov 0.0  }
  0x45   : > { %747 = vmatpush.msra.mxu2 %v389_v31  ;;  %p900_p13 = pnand %p899_p12, %p895_p7 }
  0x46   : > { %417 = vmatpush.msra.mxu1 %v389_v31  ;;  %v720_v31 = vsel %vm437_vm15, 1.0, %v979_v30 }
  0x47   : > { %748 = vmatpush.msra.mxu2 %v388_v32 }
  0x48   : > { %418 = vmatpush.msra.mxu1 %v388_v32  ;;  %v440_v32 = vmul.f32 0.3, %v436_v29 }
  0xbe   : > { %v340_v33 = vpop.f32.mrf.mxu0 }
  0xbf   : > { %v346_v34 = vmax.f32 %v340_v33, 0.0  ;;  %v716_v42 = vmul.f32 -1.442695, %v340_v33  ;;  %v450_v33 = vmul.f32 0.2, %v720_v31 }
  0xc1   : > { %v348_v35 = vmul.f32 %v346_v34, %v346_v34 }
  0xc3   : > { %718 = vmatmul.msk.f32.vlgmr.msra.gmra.mxu1 %vm396_vm5, %v348_v35 }
  0xc6   : > { %v343_v36 = vpop.f32.mrf.mxu3 }
  0xc7   : > { %v347_v37 = vmax.f32 %v343_v36, 0.0  ;;  %v717_v41 = vmul.f32 -1.442695, %v343_v36 }
  0xc9   : > { %v349_v38 = vmul.f32 %v347_v37, %v347_v37  ;;  %838 = vpow2.f32 %v717_v41 }
  0xca   : > { %840 = vpow2.f32 %v716_v42 }
  0xcb   : > { %719 = vmatmul.msk.f32.vlgmr.msra.gmra.mxu2 %vm396_vm5, %v349_v38 }
  0xcf   : > { %v839_v43 = vpop.eup %838 }
  0xd0   : > { %v357_v44 = vadd.f32 1.0, %v839_v43  ;;  %v841_v45 = vpop.eup %840 }
  0xd1   : > { %v356_v46 = vadd.f32 1.0, %v841_v45 }
  0xd2   : > { %842 = vrcp.f32 %v357_v44  ;;  %v384_v56 = vand.u32 2147483648, %v357_v44  ;;  %vm378_vm7 = vweird.f32 %v357_v44  ;;  %v382_v57 = vand.u32 2147483647, %v357_v44 }
  0xd3   : > { %844 = vrcp.f32 %v356_v46  ;;  %vm363_vm8 = vweird.f32 %v356_v46  ;;  %v369_v59 = vand.u32 2147483648, %v356_v46  ;;  %v367_v62 = vand.u32 2147483647, %v356_v46 }
  0xd4   : > { %v385_v63 = vor.u32 1.1754944e-38, %v384_v56  ;;  %vm383_vm12 = vcmp.eq.f32.partialorder %v382_v57, 8.507059e+37 }
  0xd5   : > { %v370_v1 = vor.u32 1.1754944e-38, %v369_v59  ;;  %vm368_vm13 = vcmp.eq.f32.partialorder %v367_v62, 8.507059e+37 }
  0xd8   : > { %v843_v47 = vpop.eup %842 }
  0xd9   : > { %v374_v48 = vmul.f32 %v843_v47, %v357_v44  ;;  %v845_v49 = vpop.eup %844  ;;  %vm379_vm6 = vweird.f32 %v843_v47 }
  0xda   : > { %v359_v51 = vmul.f32 %v845_v49, %v356_v46  ;;  %vm364_vm9 = vweird.f32 %v845_v49  ;;  %vm380_vm10 = vmor %vm378_vm7, %vm379_vm6 }
  0xdb   : > { %v375_v50 = vsub.f32 1.0, %v374_v48  ;;  %vm365_vm11 = vmor %vm363_vm8, %vm364_vm9  ;;  %vm585_vm8 = vcmask 254976  }
  0xdc   : > { %v360_v53 = vsub.f32 1.0, %v359_v51 }
  0xdd   : > { %v376_v52 = vmul.f32 %v843_v47, %v375_v50 }
  0xde   : > { %v361_v55 = vmul.f32 %v845_v49, %v360_v53 }
  0xdf   : > { %v377_v54 = vadd.f32 %v843_v47, %v376_v52 }
  0xe0   : > { %v362_v61 = vadd.f32 %v845_v49, %v361_v55 }
  0xe1   : > { %v381_v60 = vsel %vm380_vm10, %v843_v47, %v377_v54 }
  0xe2   : > { %v386_v0 = vsel %vm383_vm12, %v385_v63, %v381_v60  ;;  %v366_v3 = vsel %vm365_vm11, %v845_v49, %v362_v61 }
  0xe3   : > { %v371_v4 = vsel %vm368_vm13, %v370_v1, %v366_v3 }
 0x140   : > { %v420_v40 = vpop.f32.mrf.mxu1 }
 0x14e   : > { %v423_v39 = vpop.f32.mrf.mxu2 }
 0x14f   : > { %430 = vrot.lane.b32.xlu0 %v423_v39, %s978_s6 }
 0x157   : > { %428 = vrot.lane.b32.xlu0 %v420_v40, %s978_s6 }
 0x1c1   : > { %v431_v58 = vpop.permute.xlu0 %430 }
 0x1c2   : > { %v435_v2 = vmul.f32 %v431_v58, %v386_v0 }
 0x1c4   : > { %v443_v7 = vrot.slane %v435_v2, 7  ;;  %v515_v8 = vrot.slane %v435_v2, 3  ;;  %v479_v9 = vrot.slane %v435_v2, 1  ;;  %v569_v10 = vrot.slane %v435_v2, 6 }
 0x1c5   : > { %v497_v11 = vrot.slane %v435_v2, 2  ;;  %v533_v12 = vrot.slane %v435_v2, 4  ;;  %v551_v24 = vrot.slane %v435_v2, 5 }
 0x1c9   : > { %v429_v5 = vpop.permute.xlu0 %428 }
 0x1ca   : > { %v434_v6 = vmul.f32 %v429_v5, %v371_v4 }
 0x1cc   : > { %v445_v13 = vsel %vm444_vm14, %v443_v7, %v434_v6  ;;  %v514_v14 = vrot.slane %v434_v6, 4  ;;  %v478_v15 = vrot.slane %v434_v6, 2  ;;  %v461_v16 = vrot.slane %v434_v6, 1 }
 0x1cd   : > { %446 = vrot.lane.b32.xlu1 %v445_v13, %s978_s6  ;;  %v568_v17 = vrot.slane %v434_v6, 7  ;;  %v496_v18 = vrot.slane %v434_v6, 3  ;;  %v532_v19 = vrot.slane %v434_v6, 5  ;;  %v550_v20 = vrot.slane %v434_v6, 6 }
 0x1ce   : > { %v516_v21 = vsel %vm444_vm14, %v515_v8, %v514_v14  ;;  %v480_v22 = vsel %vm444_vm14, %v479_v9, %v478_v15  ;;  %v462_v23 = vsel %vm444_vm14, %v435_v2, %v461_v16 }
 0x1cf   : > { %517 = vrot.lane.b32.xlu0 %v516_v21, %s978_s6  ;;  %481 = vrot.lane.b32.xlu2 %v480_v22, %s978_s6  ;;  %v570_v25 = vsel %vm444_vm14, %v569_v10, %v568_v17  ;;  %v498_v26 = vsel %vm444_vm14, %v497_v11, %v496_v18  ;;  %v534_v27 = vsel %vm444_vm14, %v533_v12, %v532_v19 }
 0x1d0   : > { %v552_v28 = vsel %vm444_vm14, %v551_v24, %v550_v20 }
 0x1d5   : > { %463 = vrot.lane.b32.xlu1 %v462_v23, %s978_s6 }
 0x1d7   : > { %571 = vrot.lane.b32.xlu0 %v570_v25, %s978_s6  ;;  %499 = vrot.lane.b32.xlu2 %v498_v26, %s978_s6 }
 0x1dd   : > { %535 = vrot.lane.b32.xlu1 %v534_v27, %s978_s6 }
 0x1df   : > { %553 = vrot.lane.b32.xlu2 %v552_v28, %s978_s6 }
 0x229   : > { %v482_v43 = vpop.permute.xlu2 %481 }
 0x231   : > { %v500_v52 = vpop.permute.xlu2 %499 }
 0x239   : > { %v554_v9 = vpop.permute.xlu2 %553 }
 0x23f   : > { %v447_v34 = vpop.permute.xlu1 %446 }
 0x240   : > { %v449_v35 = vadd.f32 %v447_v34, %v440_v32 }
 0x241   : > { %v518_v59 = vpop.permute.xlu0 %517 }
 0x242   : > { %v451_v36 = vsub.f32 %v449_v35, %v450_v33 }
 0x244   : > { %vm452_vm0 = vcmp.gt.f32.partialorder %v451_v36, 0.2  ;;  %v460_v39 = vmul.f32 0.3, %v451_v36 }
 0x245   : > { %v721_v37 = vsel %vm452_vm0, 1.0, %v979_v30 }
 0x246   : > { %v456_v38 = vrot.slane %v721_v37, 1  ;;  %458 = vst.msk [vmem:[%s1121_s27] sm:$0x1] %vm310_vm3, %v721_v37  ;;  %v467_v41 = vmul.f32 0.2, %v721_v37 }
 0x247   : > { %v464_v40 = vpop.permute.xlu1 %463 }
 0x248   : > { %459 = vst.msk [vmem:[%s1121_s27 + $0x8] sm:$0x1] %vm310_vm3, %v456_v38  ;;  %v466_v42 = vadd.f32 %v464_v40, %v460_v39 }
 0x249   : > { %v572_v16 = vpop.permute.xlu0 %571 }
 0x24a   : > { %v468_v44 = vsub.f32 %v466_v42, %v467_v41 }
 0x24c   : > { %vm469_vm1 = vcmp.gt.f32.partialorder %v468_v44, 0.2  ;;  %v477_v45 = vmul.f32 0.3, %v468_v44 }
 0x24d   : > { %v722_v46 = vsel %vm469_vm1, 1.0, %v979_v30 }
 0x24e   : > { %v473_v47 = vrot.slane %v722_v46, 1  ;;  %475 = vst.msk [vmem:[%s1121_s27 + $0x1] sm:$0x1] %vm310_vm3, %v722_v46  ;;  %v484_v48 = vadd.f32 %v482_v43, %v477_v45  ;;  %v485_v49 = vmul.f32 0.2, %v722_v46 }
 0x24f   : > { %v536_v3 = vpop.permute.xlu1 %535 }
 0x250   : > { %476 = vst.msk [vmem:[%s1121_s27 + $0x9] sm:$0x1] %vm310_vm3, %v473_v47  ;;  %v486_v50 = vsub.f32 %v484_v48, %v485_v49 }
 0x252   : > { %vm487_vm2 = vcmp.gt.f32.partialorder %v486_v50, 0.2  ;;  %v495_v51 = vmul.f32 0.3, %v486_v50 }
 0x253   : > { %v723_v53 = vsel %vm487_vm2, 1.0, %v979_v30 }
 0x254   : > { %v491_v54 = vrot.slane %v723_v53, 1  ;;  %493 = vst.msk [vmem:[%s1121_s27 + $0x2] sm:$0x1] %vm310_vm3, %v723_v53  ;;  %v502_v55 = vadd.f32 %v500_v52, %v495_v51  ;;  %v503_v56 = vmul.f32 0.2, %v723_v53 }
 0x256   : > { %494 = vst.msk [vmem:[%s1121_s27 + $0xa] sm:$0x1] %vm310_vm3, %v491_v54  ;;  %v504_v57 = vsub.f32 %v502_v55, %v503_v56 }
 0x258   : > { %vm505_vm4 = vcmp.gt.f32.partialorder %v504_v57, 0.2  ;;  %v513_v58 = vmul.f32 0.3, %v504_v57 }
 0x259   : > { %v724_v60 = vsel %vm505_vm4, 1.0, %v979_v30 }
 0x25a   : > { %v509_v61 = vrot.slane %v724_v60, 1  ;;  %511 = vst.msk [vmem:[%s1121_s27 + $0x3] sm:$0x1] %vm310_vm3, %v724_v60  ;;  %v520_v62 = vadd.f32 %v518_v59, %v513_v58  ;;  %v521_v63 = vmul.f32 0.2, %v724_v60 }
 0x25c   : > { %512 = vst.msk [vmem:[%s1121_s27 + $0xb] sm:$0x1] %vm310_vm3, %v509_v61  ;;  %v522_v0 = vsub.f32 %v520_v62, %v521_v63 }
 0x25e   : > { %vm523_vm5 = vcmp.gt.f32.partialorder %v522_v0, 0.2  ;;  %v531_v1 = vmul.f32 0.3, %v522_v0 }
 0x25f   : > { %v725_v2 = vsel %vm523_vm5, 1.0, %v979_v30 }
 0x260   : > { %v527_v4 = vrot.slane %v725_v2, 1  ;;  %529 = vst.msk [vmem:[%s1121_s27 + $0x4] sm:$0x1] %vm310_vm3, %v725_v2  ;;  %v539_v5 = vmul.f32 0.2, %v725_v2  ;;  %v538_v6 = vadd.f32 %v536_v3, %v531_v1 }
 0x262   : > { %530 = vst.msk [vmem:[%s1121_s27 + $0xc] sm:$0x1] %vm310_vm3, %v527_v4  ;;  %v540_v7 = vsub.f32 %v538_v6, %v539_v5 }
 0x264   : > { %vm541_vm6 = vcmp.gt.f32.partialorder %v540_v7, 0.2  ;;  %v549_v8 = vmul.f32 0.3, %v540_v7 }
 0x265   : > { %v726_v10 = vsel %vm541_vm6, 1.0, %v979_v30 }
 0x266   : > { %v545_v11 = vrot.slane %v726_v10, 1  ;;  %547 = vst.msk [vmem:[%s1121_s27 + $0x5] sm:$0x1] %vm310_vm3, %v726_v10  ;;  %v556_v12 = vadd.f32 %v554_v9, %v549_v8  ;;  %v557_v13 = vmul.f32 0.2, %v726_v10 }
 0x268   : > { %548 = vst.msk [vmem:[%s1121_s27 + $0xd] sm:$0x1] %vm310_vm3, %v545_v11  ;;  %v558_v14 = vsub.f32 %v556_v12, %v557_v13 }
 0x26a   : > { %vm559_vm7 = vcmp.gt.f32.partialorder %v558_v14, 0.2  ;;  %v567_v15 = vmul.f32 0.3, %v558_v14 }
 0x26b   : > { %v727_v17 = vsel %vm559_vm7, 1.0, %v979_v30 }
 0x26c   : > { %v563_v18 = vrot.slane %v727_v17, 1  ;;  %565 = vst.msk [vmem:[%s1121_s27 + $0x6] sm:$0x1] %vm310_vm3, %v727_v17  ;;  %v574_v19 = vadd.f32 %v572_v16, %v567_v15  ;;  %v575_v20 = vmul.f32 0.2, %v727_v17 }
 0x26e   : > { %566 = vst.msk [vmem:[%s1121_s27 + $0xe] sm:$0x1] %vm310_vm3, %v563_v18  ;;  %v576_v21 = vsub.f32 %v574_v19, %v575_v20 }
 0x270   : > { %vm577_vm9 = vcmp.gt.f32.partialorder %v576_v21, 0.2  ;;  %586 = vst.msk [vmem:[#allocation2] sm:$0x3] %vm585_vm8, %v576_v21 }
 0x271   : > { %v728_v22 = vsel %vm577_vm9, 1.0, %v979_v30 }
 0x272   : > { %v581_v23 = vrot.slane %v728_v22, 1  ;;  %583 = vst.msk [vmem:[%s1121_s27 + $0x7] sm:$0x1] %vm310_vm3, %v728_v22 }
 0x274   : > { %584 = vst.msk [vmem:[%s1121_s27 + $0xf] sm:$0x1] %vm310_vm3, %v581_v23 }
 0x275   : > { %903 = shalt.err (!%p900_p13)
}
 0x276   : > { %s980_s29 = smov 128   ;;  %s981_s27 = smov 256  }
 0x277   : > { %s982_s19 = smov 8  }
 0x278   : > { %753 = dma.vmem_to_hbm [thread:$0]  (%p1069_p8), %s603_s14, 256, %s605_s13, %s588_s24, %s980_s29, %s981_s27, %s982_s19  }
 0x279 PF: > { %p765_p0 = scmp.ge.s32.totalorder %s974_s22, 2  ;;  %s619_s12 = sand.u32 1, %s946_s15  }
 0x27a   : > { %s620_s18 = scalar_lea.sflag [#allocation7], %s619_s12 }
 0x27b   : > { %p760_p1 = pnand %p765_p0, %p1073_p9 }
 0x27d   : > { %p761_p2 = pneg %p760_p1 }
 0x27f   : > { %941 = dma.done.wait (%p761_p2), %s620_s18, 256  }
 0x280   : > { %943 = vsyncadd (%p761_p2), %s620_s18, 4294967040  ;;  %s18_s22 = sadd.s32 1, %s974_s22   ;;  %s1279_s15 = smov %s950_s16 }
 0x281   : > { %p15_p4 = scmp.ge.s32.totalorder %s18_s22, 6   ;;  %s1280_s16 = smov %s954_s17 }
 0x282   : > { %s1281_s17 = smov %s1090_s10  ;;  %s1282_s18 = smov %s966_s20 }
 0x283   : > { %s1283_s19 = smov %s970_s21  ;;  %s1284_s20 = smov %s1287_s25 }
 0x284   : > { %s1285_s21 = smov %s1291_s26  ;;  %17 = sbr.rel (!%p15_p4) target bundleno = 6 (0x6), region = 123 }
 0x289   :  { %626 = vsyncpa [#allocation6], 1 }
 0x28a   :  { %628 = vsyncpa [#allocation6 + $0x1], 1 }
 0x28b   :  { %629 = vsyncpa [#allocation7], 1 }
 0x28c   :  { %631 = vsyncpa [#allocation7 + $0x1], 1 }

</bundles_post_ra>
